<compile_context>
chip_gen: v5e
topology: v5e:2x2
jax: 0.10.0
libtpu: 0.0.40
codegen_flags: <defaults>
</compile_context>

<pallas_src>
import functools

import jax
import jax.numpy as jnp
from jax.experimental import pallas as pl
from jax.experimental.pallas import tpu as pltpu


_NINE = ((-1, -1), (-1, 0), (-1, 1),
         (0, -1), (0, 0), (0, 1),
         (1, -1), (1, 0), (1, 1))

_PAR1 = pltpu.CompilerParams(dimension_semantics=("parallel",))


def _phase_base(dy, dx, d, hp, Wc):
    """Phase index + flat lane offset of the tap at original offset (dy*d, dx*d)."""
    sy, sx = dy * d, dx * d
    pr, r0 = sy % 2, hp + (sy // 2)
    pc, c0 = sx % 2, hp + (sx // 2)
    return 2 * pr + pc, r0 * Wc + c0


# ----------------------------------------------------------------------------
# XLA glue: stride-2 phase canvas, channel-major, flat spatial axis (lane axis)
# ----------------------------------------------------------------------------

def _phase_canvas_nchw(x, hp):
    """Split NCHW into 4 stride-2 phases on a zero-padded flat canvas.

    Returns (canvas (B, 4, C, Hc*Wc), Hc, Wc).  Phase p = 2*row_parity + col_parity,
    valid data at canvas rows/cols [hp, hp+extent).  Inside the kernels every 3x3
    stride-2 tap is a contiguous static lane-slice of one phase of length Ho*Wc.
    """
    B, C, H, W = x.shape
    Ho = (H - 1) // 2 + 1
    Wo = (W - 1) // 2 + 1
    Hc = Ho + 2 * hp + 1      # +1 row so flat windows of length Ho*Wc stay in bounds
    Wc = Wo + 2 * hp
    canvas = jnp.zeros((B, 4, C, Hc, Wc), x.dtype)
    for pr in range(2):
        for pc in range(2):
            ph = x[:, :, pr::2, pc::2]
            rr, cc = ph.shape[2], ph.shape[3]
            canvas = canvas.at[:, 2 * pr + pc, :, hp:hp + rr, hp:hp + cc].set(ph)
    return canvas.reshape(B, 4, C, Hc * Wc), Hc, Wc


def _phase_masks(H, W, hp, Hc, Wc):
    """(4, 1, Hc*Wc) f32 masks: 1 on the valid interior of each phase, 0 on halo."""
    rows = jnp.arange(Hc)[:, None]
    cols = jnp.arange(Wc)[None, :]
    ms = []
    for pr in range(2):
        rr = (H - pr + 1) // 2
        for pc in range(2):
            cc = (W - pc + 1) // 2
            m = ((rows >= hp) & (rows < hp + rr) & (cols >= hp) & (cols < hp + cc))
            ms.append(m.astype(jnp.float32).reshape(1, Hc * Wc))
    return jnp.stack(ms, axis=0)


# ----------------------------------------------------------------------------
# Fused DownSampler kernel: proj 1x1 + dilated depthwise + HFF + BN/PReLU +
# per-group 1x1 expansion + avg-pool branch + (optional) reinf add + final PReLU
# ----------------------------------------------------------------------------

def _fused_downsampler_kernel(xph_ref, mask_ref, wproj_ref, pjs_ref, pjb_ref,
                              pja_ref, wdw_ref, cs_ref, cb_ref, ca_ref,
                              wexp_ref, eb_ref, acta_ref, *rest,
                              k, dils, Ho, Wc, hp, has_reinf):
    if has_reinf:
        reinf_ref, o_ref, o1_ref = rest
    else:
        o_ref, o1_ref = rest
        reinf_ref = None

    Lw = Ho * Wc

    # ---- proj_1x1: grouped 1x1 conv + BN + PReLU, per phase over the canvas.
    # One aligned full store per phase; the mask re-zeroes the halo so the
    # dilated taps below see exact zero padding (no scratch zero-init, no
    # misaligned interior copy pass).
    for p in range(4):
        y = jnp.dot(wproj_ref[...], xph_ref[0, p, :, :],
                    preferred_element_type=jnp.float32)           # (n, Lc)
        y = y * pjs_ref[...] + pjb_ref[...]
        y = jnp.where(y >= 0.0, y, y * pja_ref[...])
        o1_ref[p] = y * mask_ref[p]

    # ---- avg-pool branch: 3x3, stride 2, pad 1, count_include_pad=True -----
    acc = None
    for (dy, dx) in _NINE:
        p, base = _phase_base(dy, dx, 1, hp, Wc)
        t = xph_ref[0, p, :, base:base + Lw]
        acc = t if acc is None else acc + t
    branches = [acc * (1.0 / 9.0)]                                 # (nin, Lw)

    # ---- EESP: k dilated depthwise 3x3 s2 branches + HFF + BN/PReLU, then the
    # grouped 1x1 expansion conv as k per-group (n x n) matmuls (BN scale folded
    # into the weights; only the shift remains).
    prev = None
    for g in range(k):
        d = dils[g]
        acc = None
        for t_idx, (dy, dx) in enumerate(_NINE):
            p, base = _phase_base(dy, dx, d, hp, Wc)
            term = o1_ref[p, :, base:base + Lw] * wdw_ref[9 * g + t_idx]
            acc = term if acc is None else acc + term
        if prev is not None:                                       # hierarchical fusion
            acc = acc + prev
        prev = acc
        h = acc * cs_ref[g] + cb_ref[g]                            # br_after_cat BN
        h = jnp.where(h >= 0.0, h, h * ca_ref[g])                  # br_after_cat PReLU
        eg = jnp.dot(wexp_ref[g], h,
                     preferred_element_type=jnp.float32) + eb_ref[g]
        branches.append(eg)                                        # (n, Lw)

    # ---- combine: cat([avg, eesp], C) [+ reinf], final PReLU, dense store ---
    out = jnp.concatenate(branches, axis=0)                        # (nout, Lw)
    if has_reinf:
        out = out + reinf_ref[0]
    out = jnp.where(out >= 0.0, out, out * acta_ref[...])
    o_ref[0] = out.astype(o_ref.dtype)


def fused_downsampler(xph, masks, reinf, params, *, k, dils, Ho, Wc, hp, nout):
    B = xph.shape[0]
    nin = xph.shape[2]
    Lc = xph.shape[3]
    n = params['w_proj'].shape[0]
    Lw = Ho * Wc
    has_reinf = reinf is not None

    kernel = functools.partial(_fused_downsampler_kernel, k=k, dils=tuple(dils),
                               Ho=Ho, Wc=Wc, hp=hp, has_reinf=has_reinf)
    in_specs = [
        pl.BlockSpec((1, 4, nin, Lc), lambda b: (b, 0, 0, 0)),
        pl.BlockSpec((4, 1, Lc), lambda b: (0, 0, 0)),
        pl.BlockSpec((n, nin), lambda b: (0, 0)),
        pl.BlockSpec((n, 1), lambda b: (0, 0)),
        pl.BlockSpec((n, 1), lambda b: (0, 0)),
        pl.BlockSpec((n, 1), lambda b: (0, 0)),
        pl.BlockSpec((k * 9, n, 1), lambda b: (0, 0, 0)),
        pl.BlockSpec((k, n, 1), lambda b: (0, 0, 0)),
        pl.BlockSpec((k, n, 1), lambda b: (0, 0, 0)),
        pl.BlockSpec((k, n, 1), lambda b: (0, 0, 0)),
        pl.BlockSpec((k, n, n), lambda b: (0, 0, 0)),
        pl.BlockSpec((k, n, 1), lambda b: (0, 0, 0)),
        pl.BlockSpec((nout, 1), lambda b: (0, 0)),
    ]
    args = [xph, masks, params['w_proj'], params['proj_s'], params['proj_b'],
            params['proj_a'], params['w_dw'], params['cat_s'], params['cat_b'],
            params['cat_a'], params['w_exp'], params['exp_b'], params['act_a']]
    if has_reinf:
        in_specs.append(pl.BlockSpec((1, nout, Lw), lambda b: (b, 0, 0)))
        args.append(reinf)

    return pl.pallas_call(
        kernel,
        out_shape=jax.ShapeDtypeStruct((B, nout, Lw), xph.dtype),
        grid=(B,),
        in_specs=in_specs,
        out_specs=pl.BlockSpec((1, nout, Lw), lambda b: (b, 0, 0)),
        scratch_shapes=[pltpu.VMEM((4, n, Lc), jnp.float32)],
        compiler_params=pltpu.CompilerParams(
            dimension_semantics=("parallel",),
            vmem_limit_bytes=48 * 1024 * 1024),
    )(*args)


# ----------------------------------------------------------------------------
# Standalone avg-pool (used only for the x2 reinforcement chain), NCHW -> NCHW
# ----------------------------------------------------------------------------

def _avgpool_kernel(xph_ref, o_ref, *, Ho, Wc, hp):
    Lw = Ho * Wc
    acc = None
    for (dy, dx) in _NINE:
        p, base = _phase_base(dy, dx, 1, hp, Wc)
        t = xph_ref[0, p, :, base:base + Lw]
        acc = t if acc is None else acc + t
    o_ref[0] = (acc * (1.0 / 9.0)).astype(o_ref.dtype)


def avg_pool_3x3_s2(x_nchw):
    """nn.AvgPool2d(kernel_size=3, padding=1, stride=2) on NCHW input."""
    B, C, H, W = x_nchw.shape
    Ho = (H - 1) // 2 + 1
    Wo = (W - 1) // 2 + 1
    xph, Hc, Wc = _phase_canvas_nchw(x_nchw, hp=1)
    Lc, Lw = Hc * Wc, Ho * Wc
    out = pl.pallas_call(
        functools.partial(_avgpool_kernel, Ho=Ho, Wc=Wc, hp=1),
        out_shape=jax.ShapeDtypeStruct((B, C, Lw), x_nchw.dtype),
        grid=(B,),
        in_specs=[pl.BlockSpec((1, 4, C, Lc), lambda b: (b, 0, 0, 0))],
        out_specs=pl.BlockSpec((1, C, Lw), lambda b: (b, 0, 0)),
        compiler_params=_PAR1,
    )(xph)
    return out.reshape(B, C, Ho, Wc)[:, :, :, :Wo]


# ----------------------------------------------------------------------------
# inp_reinf: 3x3 conv (pad 1) + BN + PReLU, then 1x1 conv + BN.
# Emits its result in the main kernel's padded flat (nout, Ho*Wc) layout so the
# main kernel adds it elementwise with no layout conversion.
# ----------------------------------------------------------------------------

def _inp_reinf_kernel(xc_ref, w1_ref, s1_ref, b1_ref, a1_ref,
                      w2_ref, s2_ref, b2_ref, o_ref, *, Ho, Wc):
    Lw = Ho * Wc
    taps = []
    for a in (-1, 0, 1):
        for b_ in (-1, 0, 1):
            base = (1 + a) * Wc + (1 + b_)
            taps.append(xc_ref[0, :, base:base + Lw])              # (3, Lw)
    t27 = jnp.concatenate(taps, axis=0)                            # (27, Lw)
    h = jnp.dot(w1_ref[...], t27, preferred_element_type=jnp.float32)
    h = h * s1_ref[...] + b1_ref[...]
    h = jnp.where(h >= 0.0, h, h * a1_ref[...])
    y = jnp.dot(w2_ref[...], h, preferred_element_type=jnp.float32)
    o_ref[0] = (y * s2_ref[...] + b2_ref[...]).astype(o_ref.dtype)


def inp_reinf_apply(x2d_nchw, params, *, Wc):
    B, C, Ho, Wo = x2d_nchw.shape
    nout = params['w_r2'].shape[0]
    Hc2 = Ho + 3                                   # 1-halo + 1 row of window overrun
    canvas = jnp.zeros((B, C, Hc2, Wc), x2d_nchw.dtype)
    canvas = canvas.at[:, :, 1:1 + Ho, 1:1 + Wo].set(x2d_nchw)
    canvas = canvas.reshape(B, C, Hc2 * Wc)
    Lw = Ho * Wc
    return pl.pallas_call(
        functools.partial(_inp_reinf_kernel, Ho=Ho, Wc=Wc),
        out_shape=jax.ShapeDtypeStruct((B, nout, Lw), x2d_nchw.dtype),
        grid=(B,),
        in_specs=[pl.BlockSpec((1, C, Hc2 * Wc), lambda b: (b, 0, 0)),
                  pl.BlockSpec((3, 27), lambda b: (0, 0)),
                  pl.BlockSpec((3, 1), lambda b: (0, 0)),
                  pl.BlockSpec((3, 1), lambda b: (0, 0)),
                  pl.BlockSpec((3, 1), lambda b: (0, 0)),
                  pl.BlockSpec((nout, 3), lambda b: (0, 0)),
                  pl.BlockSpec((nout, 1), lambda b: (0, 0)),
                  pl.BlockSpec((nout, 1), lambda b: (0, 0))],
        out_specs=pl.BlockSpec((1, nout, Lw), lambda b: (b, 0, 0)),
        compiler_params=_PAR1,
    )(canvas, params['w_r1'], params['r1_s'], params['r1_b'], params['r1_a'],
      params['w_r2'], params['r2_s'], params['r2_b'])


# ----------------------------------------------------------------------------
# Parameter initialization (deterministic synthetic, BN folded to scale/shift)
# ----------------------------------------------------------------------------

def init_params(key, nin, nout, k=4):
    nout_new = nout - nin
    n = nout_new // k
    assert nout_new - (k - 1) * n == n, "n and n1 must match (depthwise constraint)"
    assert nin % k == 0 and n % k == 0, "grouped 1x1 conv divisibility"

    it = iter(list(jax.random.split(key, 64)))

    def nrm(shape, scale=0.2):
        return scale * jax.random.normal(next(it), shape, jnp.float32)

    def bn_fold(c):
        gamma = 1.0 + 0.1 * jax.random.normal(next(it), (c,), jnp.float32)
        beta = 0.1 * jax.random.normal(next(it), (c,), jnp.float32)
        mean = 0.1 * jax.random.normal(next(it), (c,), jnp.float32)
        var = 1.0 + 0.1 * jax.random.uniform(next(it), (c,), jnp.float32)
        scale = gamma / jnp.sqrt(var + 1e-5)
        return scale, beta - mean * scale

    def prelu(c):
        return 0.25 + 0.05 * jax.random.normal(next(it), (c,), jnp.float32)

    p = {}
    # proj_1x1 = CBR(nin, n, 1, groups=k): block-diagonal (n, nin) weight (W @ x)
    p['w_proj'] = jax.scipy.linalg.block_diag(
        *[nrm((n // k, nin // k)) for _ in range(k)])
    s, b = bn_fold(n)
    p['proj_s'], p['proj_b'] = s[:, None], b[:, None]
    p['proj_a'] = prelu(n)[:, None]

    # spp_dw: k depthwise 3x3 convs, per-tap per-channel weights
    p['w_dw'] = nrm((k * 9, n, 1))

    # br_after_cat = BN(nout_new) + PReLU(nout_new), group-major (k, n, 1)
    s, b = bn_fold(nout_new)
    p['cat_s'], p['cat_b'] = s.reshape(k, n, 1), b.reshape(k, n, 1)
    p['cat_a'] = prelu(nout_new).reshape(k, n, 1)

    # conv_1x1_exp = CB(nout_new, nout_new, 1, groups=k): per-group (n, n) weight
    # with the following BN scale folded into its rows; only the shift remains.
    w_exp = nrm((k, n, n))
    s, b = bn_fold(nout_new)
    p['w_exp'] = w_exp * s.reshape(k, n, 1)
    p['exp_b'] = b.reshape(k, n, 1)

    # inp_reinf = CBR(3, 3, 3, 1) -> CB(3, nout, 1, 1); 3x3 weight as (3, 27)
    p['w_r1'] = nrm((3, 27))
    s, b = bn_fold(3)
    p['r1_s'], p['r1_b'] = s[:, None], b[:, None]
    p['r1_a'] = prelu(3)[:, None]
    p['w_r2'] = nrm((nout, 3))
    s, b = bn_fold(nout)
    p['r2_s'], p['r2_b'] = s[:, None], b[:, None]

    # final PReLU(nout)
    p['act_a'] = prelu(nout)[:, None]
    return p


# ----------------------------------------------------------------------------
# DownSampler forward (NCHW in, NCHW out)
# ----------------------------------------------------------------------------

def downsampler_forward(params, downtimes, x_nchw, x2_nchw=None, k=4, r_lim=9):
    B, nin, H, W = x_nchw.shape
    nout = params['act_a'].shape[0]
    Ho = (H - 1) // 2 + 1
    Wo = (W - 1) // 2 + 1

    dmap = {3: 1, 5: 2, 7: 3, 9: 4, 11: 5, 13: 6, 15: 7, 17: 8}
    ksizes = sorted([(3 + 2 * i) if (3 + 2 * i) <= r_lim else 3 for i in range(k)])
    dils = tuple(dmap[s] for s in ksizes)
    hp = max(1, (max(dils) + 1) // 2)          # halo needed in phase coordinates

    xph, Hc, Wc = _phase_canvas_nchw(x_nchw, hp)          # (B, 4, nin, Hc*Wc)
    masks = _phase_masks(H, W, hp, Hc, Wc)                # (4, 1, Hc*Wc)

    # ---- input reinforcement side path (skipped entirely when x2 is None) ---
    reinf = None
    if x2_nchw is not None:
        cur = x2_nchw
        for _ in range(downtimes):
            cur = avg_pool_3x3_s2(cur)
        assert cur.shape[2] == Ho and cur.shape[3] == Wo, (cur.shape, Ho, Wo)
        reinf = inp_reinf_apply(cur, params, Wc=Wc)       # (B, nout, Ho*Wc)

    # ---- fused avg-pool + EESP + combine + final PReLU ----------------------
    out = fused_downsampler(xph, masks, reinf, params, k=k, dils=dils,
                            Ho=Ho, Wc=Wc, hp=hp, nout=nout)   # (B, nout, Ho*Wc)
    # crop away the Wc -> Wo halo columns (cheap XLA slice, output is NCHW)
    return out.reshape(B, nout, Ho, Wc)[:, :, :, :Wo]


# ----------------------------------------------------------------------------

if __name__ == "__main__":
    B, nin, nout, H, W = 2, 8, 24, 16, 16
    k, r_lim, downtimes = 4, 9, 1

    key = jax.random.PRNGKey(0)
    kp, kx, kx2 = jax.random.split(key, 3)

    params = init_params(kp, nin, nout, k=k)
    x = jax.random.normal(kx, (B, nin, H, W), jnp.float32)   # NCHW, like PyTorch
    x2 = jax.random.normal(kx2, (B, 3, H, W), jnp.float32)   # RGB reinforcement input

    out = downsampler_forward(params, downtimes, x, x2, k=k, r_lim=r_lim)
    out = jax.block_until_ready(out)
    assert out.shape == (B, nout, H // 2, W // 2), out.shape
    assert bool(jnp.all(jnp.isfinite(out)))

    # also exercise the reinforcement-free static variant (no zeros tensor / add)
    out_nr = downsampler_forward(params, downtimes, x, None, k=k, r_lim=r_lim)
    out_nr = jax.block_until_ready(out_nr)
    assert out_nr.shape == out.shape
    assert bool(jnp.all(jnp.isfinite(out_nr)))

    print("KERNEL_OK")
</pallas_src>

<mosaic_0001>
module attributes {stable_mosaic.version = 11 : i64} {
  func.func @_avgpool_kernel(%arg0: i32, %arg1: memref<1x4x3x110xf32, #tpu.memory_space<vmem>>, %arg2: memref<1x3x80xf32, #tpu.memory_space<vmem>>) attributes {dimension_semantics = [#tpu.dimension_semantics<parallel>], iteration_bounds = array<i64: 2>, scalar_prefetch = 0 : i64, scratch_operands = 0 : i64, tpu.core_type = #tpu.core_type<tc>, window_params = [{transform_indices = @transform_0, window_bounds = array<i64: 1, 4, 3, 110>}, {transform_indices = @transform_1, window_bounds = array<i64: 1, 3, 80>}]} {
    %c0 = arith.constant 0 : index
    %c3 = arith.constant 3 : index
    %c0_0 = arith.constant 0 : index
    %c0_1 = arith.constant 0 : index
    %0 = vector.load %arg1[%c0, %c3, %c0_0, %c0_1] : memref<1x4x3x110xf32, #tpu.memory_space<vmem>>, vector<1x1x3x80xf32>
    %1 = vector.shape_cast %0 : vector<1x1x3x80xf32> to vector<3x80xf32>
    %c0_2 = arith.constant 0 : index
    %c2 = arith.constant 2 : index
    %c0_3 = arith.constant 0 : index
    %c1 = arith.constant 1 : index
    %2 = vector.load %arg1[%c0_2, %c2, %c0_3, %c1] : memref<1x4x3x110xf32, #tpu.memory_space<vmem>>, vector<1x1x3x80xf32>
    %3 = vector.shape_cast %2 : vector<1x1x3x80xf32> to vector<3x80xf32>
    %4 = arith.addf %1, %3 : vector<3x80xf32>
    %c0_4 = arith.constant 0 : index
    %c3_5 = arith.constant 3 : index
    %c0_6 = arith.constant 0 : index
    %c1_7 = arith.constant 1 : index
    %5 = vector.load %arg1[%c0_4, %c3_5, %c0_6, %c1_7] : memref<1x4x3x110xf32, #tpu.memory_space<vmem>>, vector<1x1x3x80xf32>
    %6 = vector.shape_cast %5 : vector<1x1x3x80xf32> to vector<3x80xf32>
    %7 = arith.addf %4, %6 : vector<3x80xf32>
    %c0_8 = arith.constant 0 : index
    %c1_9 = arith.constant 1 : index
    %c0_10 = arith.constant 0 : index
    %c10 = arith.constant 10 : index
    %8 = vector.load %arg1[%c0_8, %c1_9, %c0_10, %c10] : memref<1x4x3x110xf32, #tpu.memory_space<vmem>>, vector<1x1x3x80xf32>
    %9 = vector.shape_cast %8 : vector<1x1x3x80xf32> to vector<3x80xf32>
    %10 = arith.addf %7, %9 : vector<3x80xf32>
    %c0_11 = arith.constant 0 : index
    %c0_12 = arith.constant 0 : index
    %c0_13 = arith.constant 0 : index
    %c11 = arith.constant 11 : index
    %11 = vector.load %arg1[%c0_11, %c0_12, %c0_13, %c11] : memref<1x4x3x110xf32, #tpu.memory_space<vmem>>, vector<1x1x3x80xf32>
    %12 = vector.shape_cast %11 : vector<1x1x3x80xf32> to vector<3x80xf32>
    %13 = arith.addf %10, %12 : vector<3x80xf32>
    %c0_14 = arith.constant 0 : index
    %c1_15 = arith.constant 1 : index
    %c0_16 = arith.constant 0 : index
    %c11_17 = arith.constant 11 : index
    %14 = vector.load %arg1[%c0_14, %c1_15, %c0_16, %c11_17] : memref<1x4x3x110xf32, #tpu.memory_space<vmem>>, vector<1x1x3x80xf32>
    %15 = vector.shape_cast %14 : vector<1x1x3x80xf32> to vector<3x80xf32>
    %16 = arith.addf %13, %15 : vector<3x80xf32>
    %c0_18 = arith.constant 0 : index
    %c3_19 = arith.constant 3 : index
    %c0_20 = arith.constant 0 : index
    %c10_21 = arith.constant 10 : index
    %17 = vector.load %arg1[%c0_18, %c3_19, %c0_20, %c10_21] : memref<1x4x3x110xf32, #tpu.memory_space<vmem>>, vector<1x1x3x80xf32>
    %18 = vector.shape_cast %17 : vector<1x1x3x80xf32> to vector<3x80xf32>
    %19 = arith.addf %16, %18 : vector<3x80xf32>
    %c0_22 = arith.constant 0 : index
    %c2_23 = arith.constant 2 : index
    %c0_24 = arith.constant 0 : index
    %c11_25 = arith.constant 11 : index
    %20 = vector.load %arg1[%c0_22, %c2_23, %c0_24, %c11_25] : memref<1x4x3x110xf32, #tpu.memory_space<vmem>>, vector<1x1x3x80xf32>
    %21 = vector.shape_cast %20 : vector<1x1x3x80xf32> to vector<3x80xf32>
    %22 = arith.addf %19, %21 : vector<3x80xf32>
    %c0_26 = arith.constant 0 : index
    %c3_27 = arith.constant 3 : index
    %c0_28 = arith.constant 0 : index
    %c11_29 = arith.constant 11 : index
    %23 = vector.load %arg1[%c0_26, %c3_27, %c0_28, %c11_29] : memref<1x4x3x110xf32, #tpu.memory_space<vmem>>, vector<1x1x3x80xf32>
    %24 = vector.shape_cast %23 : vector<1x1x3x80xf32> to vector<3x80xf32>
    %25 = arith.addf %22, %24 : vector<3x80xf32>
    %cst = arith.constant 0.111111112 : f32
    %26 = vector.broadcast %cst : f32 to vector<3x80xf32>
    %27 = arith.mulf %25, %26 : vector<3x80xf32>
    %c0_30 = arith.constant 0 : index
    %c0_31 = arith.constant 0 : index
    %c0_32 = arith.constant 0 : index
    %28 = vector.load %arg2[%c0_30, %c0_31, %c0_32] : memref<1x3x80xf32, #tpu.memory_space<vmem>>, vector<1x3x80xf32>
    %29 = vector.shape_cast %28 : vector<1x3x80xf32> to vector<3x80xf32>
    %30 = vector.shape_cast %27 : vector<3x80xf32> to vector<1x3x80xf32>
    tpu.vector_store %arg2[%c0_30, %c0_31, %c0_32], %30 {strides = array<i32>} : memref<1x3x80xf32, #tpu.memory_space<vmem>>, vector<1x3x80xf32>,
    return
  }
  func.func @transform_0(%arg0: i32) -> (i32, i32, i32, i32) {
    %c0_i32 = arith.constant 0 : i32
    %c0_i32_0 = arith.constant 0 : i32
    %c0_i32_1 = arith.constant 0 : i32
    %c0_i32_2 = arith.constant 0 : i32
    return %arg0, %c0_i32, %c0_i32_0, %c0_i32_1 : i32, i32, i32, i32
  }
  func.func @transform_1(%arg0: i32) -> (i32, i32, i32) {
    %c0_i32 = arith.constant 0 : i32
    %c0_i32_0 = arith.constant 0 : i32
    %c0_i32_1 = arith.constant 0 : i32
    return %arg0, %c0_i32, %c0_i32_0 : i32, i32, i32
  }
}

</mosaic_0001>

<bundles_post_ra>
// kernel: tpu_custom_call.1
= control target key start
LH: loop header
LB: loop body
LE: loop exit
PB: predicated region body
PF: predicated region fallthrough
CT: control target
= control target key end

     0   :  { %s260_s6 = smov 0   ;;  %s281_s0 = inlined_call_operand.vmem [shape: f32[2,4,3,110], index: 0, kind: input, shape index: {}]   ;;  %s282_s1 = inlined_call_operand.vmem [shape: f32[2,3,80], index: 1, kind: output, shape index: {}]  }
   0x1 LB: > { %s214_s7 = sadd.s32 4294967295, %s245_s6   ;;  %p218_p0 = scmp.ge.s32.totalorder %s245_s6, 1  ;;  %s245_s6 = sphi %s260_s6, %s11_s6  }
   0x2   : > { %p87_p1 = scmp.lt.s32.totalorder %s245_s6, 3 }
   0x4   : > { %p88_p2 = pnand %p218_p0, %p87_p1 }
   0x5   : > { %p106_p3 = scmp.lt.s32.totalorder (!%p88_p2), %s214_s7, 1  ;;  %s247_s12 = smov (!%p88_p2), 127  }
   0x6   : > { %91 = sbr.rel (%p88_p2) target bundleno = 155 (0x9b), region = 24  ;;  %s248_s13 = smov (!%p88_p2), 118  }
   0x7   : > { %s249_s14 = smov (!%p88_p2), 117  }
   0xb   : > { %s284_s7 = smov (!%p106_p3, %s214_s7), 1  ;;  %vm159_vm0 = vcmask 649216  }
   0xc   : > { %s227_s8 = sshll.u32 %s284_s7, 4  ;;  %s221_s15 = sshll.u32 %s284_s7, 2 }
   0xd   : > { %s110_s11 = scalar_lea.vmem %s281_s0, %s227_s8  ;;  %s114_s18 = scalar_lea.vmem %s282_s1, %s221_s15 }
   0xe   : > { %v223_v0 = vld [vmem:[%s110_s11 + $0x8] sm:$0x7]  ;;  %v224_v1 = vld [vmem:[%s110_s11 + $0x4] sm:$0x7]  ;;  %v222_v2 = vld [vmem:[%s110_s11 + $0xc] sm:$0x7] }
   0xf   : > { %120 = vrot.lane.b32.xlu0 %v223_v0, %s247_s12  ;;  %132 = vrot.lane.b32.xlu1 %v224_v1, %s248_s13  ;;  %v136_v3 = vld [vmem:[%s110_s11] sm:$0x7] }
  0x10   : > { %142 = vrot.lane.b32.xlu2 %v224_v1, %s249_s14 }
  0x17   : > { %125 = vrot.lane.b32.xlu0 %v222_v2, %s247_s12  ;;  %138 = vrot.lane.b32.xlu1 %v136_v3, %s249_s14 }
  0x18   : > { %146 = vrot.lane.b32.xlu2 %v222_v2, %s248_s13 }
  0x1f   : > { %150 = vrot.lane.b32.xlu0 %v223_v0, %s249_s14  ;;  %154 = vrot.lane.b32.xlu1 %v222_v2, %s249_s14 }
  0x6a   : > { %v143_v6 = vpop.permute.xlu2 %142 }
  0x72   : > { %v147_v13 = vpop.permute.xlu2 %146 }
  0x81   : > { %v121_v4 = vpop.permute.xlu0 %120  ;;  %v133_v5 = vpop.permute.xlu1 %132 }
  0x82   : > { %v123_v7 = vadd.f32 %v222_v2, %v121_v4 }
  0x89   : > { %v126_v8 = vpop.permute.xlu0 %125  ;;  %v139_v9 = vpop.permute.xlu1 %138 }
  0x8a   : > { %v128_v10 = vadd.f32 %v126_v8, %v123_v7 }
  0x8c   : > { %v135_v11 = vadd.f32 %v133_v5, %v128_v10 }
  0x8e   : > { %v141_v12 = vadd.f32 %v139_v9, %v135_v11 }
  0x90   : > { %v145_v14 = vadd.f32 %v143_v6, %v141_v12 }
  0x91   : > { %v151_v15 = vpop.permute.xlu0 %150  ;;  %v155_v17 = vpop.permute.xlu1 %154 }
  0x92   : > { %v149_v16 = vadd.f32 %v147_v13, %v145_v14 }
  0x94   : > { %v153_v18 = vadd.f32 %v151_v15, %v149_v16 }
  0x96   : > { %v157_v19 = vadd.f32 %v155_v17, %v153_v18 }
  0x98   : > { %v158_v20 = vmul.f32 0.11111111, %v157_v19 }
  0x9a   : > { %160 = vst.msk [vmem:[%s114_s18] sm:$0x7] %vm159_vm0, %v158_v20 }
  0x9b PF: > { %s11_s6 = sadd.s32 1, %s245_s6  }
  0x9c   : > { %p8_p4 = scmp.ge.s32.totalorder %s11_s6, 4  }
  0x9e   :  { %10 = sbr.rel (!%p8_p4) target bundleno = 1 (0x1), region = 57 }

</bundles_post_ra>
